<compile_context>
chip_gen: v7x
topology: tpu7x:2x2x1
jax: 0.10.0
libtpu: 0.0.40
codegen_flags: <defaults>
</compile_context>

<pallas_src>
import jax
import jax.numpy as jnp
from jax import lax
from jax.experimental import pallas as pl
from jax.experimental.pallas import tpu as pltpu


# A @ B.T as a transposed contraction (feeds the MXU directly, no XLU transpose).
_NT_DIMS = (((1,), (1,)), ((), ()))

# Large-but-finite "minus infinity" for masking (keeps the kernel inf-free).
_NEG_HUGE = -1.0e30


def _pick_block(n, cap, mult):
    """Largest multiple of `mult` that divides `n` and is <= cap.

    Returns `n` itself when `n <= cap` (a full-size block is always legal
    w.r.t. the (8, 128) tiling rule) and None when no such divisor exists
    (the caller then pads the batch and masks in-kernel).
    """
    if n <= cap:
        return n
    t = (cap // mult) * mult
    while t >= mult:
        if n % t == 0:
            return t
        t -= mult
    return None


def _round_up(x, m):
    return -(-x // m) * m


def _lane_pad(x):
    return max(128, _round_up(x, 128))


def _vmem_bytes_estimate(tm, tn, n_cb, d, d2, itemsize):
    """Rough VMEM footprint: double-buffered inputs + scratch + live temps."""
    dpad, d2pad, tnpad = _lane_pad(d), _lane_pad(d2), _lane_pad(tn)
    inputs = 2 * (itemsize * (2 * tm * dpad + tn * dpad + tm * d2pad + tn * d2pad)
                  + 4 * (tm * 128 + tnpad))
    scratch = (4 * n_cb * tm * tnpad              # masked feature-score cache
               + 4 * tm * 128                     # consolidated LSE stats
               + itemsize * tm * (dpad + d2pad))  # 1/T-scaled row copies
    temps = 6 * 4 * tm * tnpad                    # live (tm, tn) f32 temporaries
    return inputs + scratch + temps


def _make_kernel(T, n_cb, tm, tn, b_true, b_pad):
    inv_t = float(1.0 / T)
    need_mask = b_pad > b_true   # padded batch -> mask rows/cols in-kernel

    def kernel(xa_ref, xvr_ref, xvc_ref, fr_ref, fc_ref, tcol_ref, trow_ref,
               pos_out_ref, neg_out_ref,
               stats_ref, xas_ref, fs_ref, cache_ref):
        rb = pl.program_id(0)
        cb = pl.program_id(1)

        # ---------------- per-row-block init (cb == 0) ----------------
        @pl.when(cb == 0)
        def _init():
            lane4 = lax.broadcasted_iota(jnp.int32, stats_ref.shape, 1)
            # stats columns: 0=m_pos, 1=s_pos, 2=m_neg, 3=s_neg
            stats_ref[...] = jnp.where(lane4 % 2 == 0,
                                       jnp.float32(_NEG_HUGE), jnp.float32(0.0))
            # Fold 1/T into the row operands once per row block (not per cb).
            xas_ref[...] = xa_ref[...] * inv_t
            fs_ref[...] = fr_ref[...] * inv_t

        # -------- single sweep: online LSE + masked-score caching --------
        st = stats_ref[...]
        m_pos, s_pos = st[:, 0:1], st[:, 1:2]
        m_neg, s_neg = st[:, 2:3], st[:, 3:4]

        s_p = lax.dot_general(xas_ref[...], xvc_ref[...], _NT_DIMS,
                              preferred_element_type=jnp.float32)
        s_n = lax.dot_general(fs_ref[...], fc_ref[...], _NT_DIMS,
                              preferred_element_type=jnp.float32)

        if need_mask:
            col_ok = (cb * tn + lax.broadcasted_iota(jnp.int32, (1, tn), 1)) < b_true
            s_p = jnp.where(col_ok, s_p, _NEG_HUGE)
            s_n = jnp.where(col_ok, s_n, _NEG_HUGE)

        m_pos_new = jnp.maximum(m_pos, jnp.max(s_p, axis=1, keepdims=True))
        s_pos_new = (s_pos * jnp.exp(m_pos - m_pos_new)
                     + jnp.sum(jnp.exp(s_p - m_pos_new), axis=1, keepdims=True))
        m_neg_new = jnp.maximum(m_neg, jnp.max(s_n, axis=1, keepdims=True))
        s_neg_new = (s_neg * jnp.exp(m_neg - m_neg_new)
                     + jnp.sum(jnp.exp(s_n - m_neg_new), axis=1, keepdims=True))

        lane4 = lax.broadcasted_iota(jnp.int32, stats_ref.shape, 1)
        stats_ref[...] = jnp.where(
            lane4 == 0, m_pos_new,
            jnp.where(lane4 == 1, s_pos_new,
                      jnp.where(lane4 == 2, m_neg_new, s_neg_new)))

        # Cache the class-masked feature scores so the loss sweep never
        # re-issues the f @ f.T matmul or re-streams the column operand.
        # same_class[i, j] = ((t_i + 1) * (t_j + 1) == 2)  (torch semantics).
        same = ((tcol_ref[...] + 1.0) * (trow_ref[...] + 1.0)) == 2.0
        cache_ref[cb] = jnp.where(same, s_n, _NEG_HUGE)

        # ---------------- per-row-block finalize (cb == last) ----------------
        @pl.when(cb == n_cb - 1)
        def _finalize():
            stf = stats_ref[...]
            lse_pos = stf[:, 0:1] + jnp.log(stf[:, 1:2])
            lse_neg = stf[:, 2:3] + jnp.log(stf[:, 3:4])

            # positive branch: sum_i (lse_i - (x_a_i . x_v_i) / T)
            diag = jnp.sum(xa_ref[...].astype(jnp.float32)
                           * xvr_ref[...].astype(jnp.float32),
                           axis=1, keepdims=True) * inv_t
            pos_terms = lse_pos - diag

            # negative branch: sum_j log(1 - exp(s_ij - lse_i)) over same-class j.
            # NOTE: torch divides by the *column*-indexed row sum; because the
            # feature-score matrix and the mask are symmetric the total over
            # (i, j) is identical, so the row-LSE form is exact here.
            def body(i, acc):
                p = jnp.exp(cache_ref[i] - lse_neg)
                return acc + jnp.sum(jnp.log(1.0 - p), axis=1, keepdims=True)

            neg_terms = lax.fori_loop(0, n_cb, body,
                                      jnp.zeros((tm, 1), jnp.float32))

            if need_mask:
                row_ok = (rb * tm
                          + lax.broadcasted_iota(jnp.int32, (tm, 1), 0)) < b_true
                pos_terms = jnp.where(row_ok, pos_terms, 0.0)
                neg_terms = jnp.where(row_ok, neg_terms, 0.0)

            pos_out_ref[...] = jnp.sum(pos_terms, axis=(0, 1),
                                       keepdims=True).reshape(1, 1, 1)
            neg_out_ref[...] = (-jnp.sum(neg_terms, axis=(0, 1),
                                         keepdims=True)).reshape(1, 1, 1)

    return kernel


def augment_batch_criterion(x_a, x_v, out_feature, target, T=0.1, mode="all",
                            row_block=512, col_block=512,
                            matmul_dtype=jnp.float32):
    """Pallas TPU implementation of Augment_BatchCriterion.forward.

    x_a, x_v    : [B, D]  embeddings
    out_feature : [B, D2] embeddings
    target      : [B]     integer class labels
    Returns a scalar float32 loss (mode in {'all', 'pos', 'neg'}).
    """
    B, D = x_a.shape
    assert x_v.shape == (B, D)
    assert out_feature.shape[0] == B
    D2 = out_feature.shape[1]
    assert target.shape == (B,)

    row_block = max(int(row_block), 8)
    col_block = max(int(col_block), 128)
    itemsize = jnp.dtype(matmul_dtype).itemsize

    # ---- tile selection (pad + mask when B has no clean tile divisor) ----
    tm = _pick_block(B, row_block, 8)
    tn = _pick_block(B, col_block, 128)
    if tm is None or tn is None:
        b_pad = _round_up(B, 128)
        tm = _pick_block(b_pad, row_block, 8)
        tn = _pick_block(b_pad, col_block, 128)
    else:
        b_pad = B

    # v7x megacore: prefer >= 2 row blocks so both TensorCores get work.
    if b_pad // tm < 2:
        half_cap = (b_pad // 2) // 8 * 8
        if half_cap >= 8:
            tm_alt = _pick_block(b_pad, half_cap, 8)
            if tm_alt is not None:
                tm = tm_alt

    # Keep the per-row-block score cache + tiles inside a conservative VMEM
    # budget (v7x has only 64 MiB physical VMEM per TensorCore).
    budget = 40 * 1024 * 1024
    while (_vmem_bytes_estimate(tm, tn, b_pad // tn, D, D2, itemsize) > budget
           and tm > 8):
        cap = max(8, (tm // 2) // 8 * 8)
        tm_new = _pick_block(b_pad, cap, 8)
        if tm_new is None or tm_new >= tm:
            break
        tm = tm_new
    while (_vmem_bytes_estimate(tm, tn, b_pad // tn, D, D2, itemsize) > budget
           and tn > 128):
        cap = max(128, (tn // 2) // 128 * 128)
        tn_new = _pick_block(b_pad, cap, 128)
        if tn_new is None or tn_new >= tn:
            break
        tn = tn_new
    # TODO(synk): for batches where even tm=8 blows the cache budget, fall back
    # to a two-pass (recompute) scheme instead of tiny row blocks.

    n_rb = b_pad // tm
    n_cb = b_pad // tn

    # ---- padding (masked inside the kernel) ----
    if b_pad > B:
        pad = b_pad - B
        x_a = jnp.pad(x_a, ((0, pad), (0, 0)))
        x_v = jnp.pad(x_v, ((0, pad), (0, 0)))
        out_feature = jnp.pad(out_feature, ((0, pad), (0, 0)))
        target = jnp.pad(target, (0, pad), constant_values=-1)

    xa = x_a.astype(matmul_dtype)
    xv = x_v.astype(matmul_dtype)
    f = out_feature.astype(matmul_dtype)
    tcol = target.astype(jnp.float32).reshape(b_pad, 1)
    trow = target.astype(jnp.float32).reshape(1, b_pad)

    est = _vmem_bytes_estimate(tm, tn, n_cb, D, D2, itemsize)
    vmem_limit = int(min(64 * 1024 * 1024, max(32 * 1024 * 1024, int(est * 1.3))))

    cost = pl.CostEstimate(
        flops=int(2 * b_pad * b_pad * (D + D2)),
        transcendentals=int(3 * b_pad * b_pad),
        bytes_accessed=int(itemsize * (n_rb * b_pad * (D + D2)
                                       + b_pad * (2 * D + D2))),
    )

    in_specs = [
        pl.BlockSpec((tm, D), lambda rb, cb: (rb, 0)),     # x_a rows
        pl.BlockSpec((tm, D), lambda rb, cb: (rb, 0)),     # x_v rows (diag)
        pl.BlockSpec((tn, D), lambda rb, cb: (cb, 0)),     # x_v cols
        pl.BlockSpec((tm, D2), lambda rb, cb: (rb, 0)),    # feature rows
        pl.BlockSpec((tn, D2), lambda rb, cb: (cb, 0)),    # feature cols
        pl.BlockSpec((tm, 1), lambda rb, cb: (rb, 0)),     # target column
        pl.BlockSpec((1, tn), lambda rb, cb: (0, cb)),     # target row
    ]
    out_specs = [
        pl.BlockSpec((1, 1, 1), lambda rb, cb: (rb, 0, 0)),  # pos partials
        pl.BlockSpec((1, 1, 1), lambda rb, cb: (rb, 0, 0)),  # neg partials
    ]
    out_shape = (
        jax.ShapeDtypeStruct((n_rb, 1, 1), jnp.float32),
        jax.ShapeDtypeStruct((n_rb, 1, 1), jnp.float32),
    )

    pos_parts, neg_parts = pl.pallas_call(
        _make_kernel(float(T), n_cb, tm, tn, B, b_pad),
        out_shape=out_shape,
        grid_spec=pltpu.PrefetchScalarGridSpec(
            num_scalar_prefetch=0,
            grid=(n_rb, n_cb),
            in_specs=in_specs,
            out_specs=out_specs,
            scratch_shapes=[
                pltpu.VMEM((tm, 4), jnp.float32),          # m/s LSE stats
                pltpu.VMEM((tm, D), matmul_dtype),         # x_a / T
                pltpu.VMEM((tm, D2), matmul_dtype),        # out_feature / T
                pltpu.VMEM((n_cb, tm, tn), jnp.float32),   # masked feature scores
            ]),
        compiler_params=pltpu.CompilerParams(
            dimension_semantics=("parallel", "arbitrary"),
            vmem_limit_bytes=vmem_limit),
        cost_estimate=cost,
    )(xa, xv, xv, f, f, tcol, trow)

    loss_pos = jnp.sum(pos_parts) / B
    loss_neg = jnp.sum(neg_parts) / B
    # TODO(synk): for mode='pos'/'neg' the kernel still computes both branches;
    # only the selection happens here.
    if mode == "pos":
        return loss_pos
    if mode == "neg":
        return loss_neg
    return loss_pos + loss_neg


def _reference(x_a, x_v, out_feature, target, T):
    """Pure-JAX transcription of the PyTorch forward (mode='all')."""
    B = x_a.shape[0]
    pos = jnp.exp(jnp.sum(x_a * x_v, axis=1) / T)
    pos_all = jnp.exp(jnp.dot(x_a, x_v.T) / T)
    loss_pos = -jnp.sum(jnp.log(pos / jnp.sum(pos_all, axis=1))) / B

    t = target.astype(jnp.float32)[:, None]
    same = (jnp.dot(t + 1.0, (t + 1.0).T) == 2.0).astype(jnp.float32)
    neg_all = jnp.exp(jnp.dot(out_feature, out_feature.T) / T)
    neg = neg_all * same
    neg_div = jnp.sum(neg_all, axis=1)[None, :]     # torch: sum(1).repeat(B, 1)
    loss_neg = -jnp.sum(jnp.log(1.0 - neg / neg_div)) / B
    return loss_pos + loss_neg


if __name__ == "__main__":
    key = jax.random.PRNGKey(0)

    def make_inputs(k, B, D, D2):
        k1, k2, k3, k4 = jax.random.split(k, 4)
        xa = jax.random.normal(k1, (B, D), jnp.float32)
        xa = xa / jnp.linalg.norm(xa, axis=1, keepdims=True)
        xv = jax.random.normal(k2, (B, D), jnp.float32)
        xv = xv / jnp.linalg.norm(xv, axis=1, keepdims=True)
        f = jax.random.normal(k3, (B, D2), jnp.float32)
        f = f / jnp.linalg.norm(f, axis=1, keepdims=True)
        t = jax.random.randint(k4, (B,), 0, 2, jnp.int32)
        return xa, xv, f, t

    k1, k2, k3 = jax.random.split(key, 3)

    # Case 1: tiny batch, single tile (B=8, D=16, D2=32); f32 and bf16 paths.
    xa, xv, f, t = make_inputs(k1, 8, 16, 32)
    ref = _reference(xa, xv, f, t, 0.1)
    out = jax.block_until_ready(augment_batch_criterion(xa, xv, f, t, T=0.1))
    assert jnp.isfinite(out), out
    assert jnp.allclose(out, ref, rtol=5e-2, atol=5e-2), (out, ref)

    out_bf16 = jax.block_until_ready(
        augment_batch_criterion(xa, xv, f, t, T=0.1, matmul_dtype=jnp.bfloat16))
    assert jnp.isfinite(out_bf16), out_bf16
    assert jnp.allclose(out_bf16, ref, rtol=1e-1, atol=2e-1), (out_bf16, ref)

    # Case 2: multi-block grid (online LSE + cache across 2 column blocks,
    # megacore row-block split 256 -> 128).
    xa, xv, f, t = make_inputs(k2, 256, 16, 16)
    ref = _reference(xa, xv, f, t, 0.1)
    out = jax.block_until_ready(
        augment_batch_criterion(xa, xv, f, t, T=0.1, row_block=256, col_block=128))
    assert jnp.isfinite(out), out
    assert jnp.allclose(out, ref, rtol=5e-2, atol=5e-2), (out, ref)

    # Case 3: ragged batch -> pad + in-kernel masking path (B=20, forced tm=8).
    xa, xv, f, t = make_inputs(k3, 20, 16, 32)
    ref = _reference(xa, xv, f, t, 0.1)
    out = jax.block_until_ready(
        augment_batch_criterion(xa, xv, f, t, T=0.1, row_block=8, col_block=128))
    assert jnp.isfinite(out), out
    assert jnp.allclose(out, ref, rtol=5e-2, atol=5e-2), (out, ref)

    # mode selection consistency on the same configuration.
    lp = jax.block_until_ready(
        augment_batch_criterion(xa, xv, f, t, T=0.1, mode="pos",
                                row_block=8, col_block=128))
    ln = jax.block_until_ready(
        augment_batch_criterion(xa, xv, f, t, T=0.1, mode="neg",
                                row_block=8, col_block=128))
    assert jnp.allclose(lp + ln, out, rtol=1e-4, atol=1e-4), (lp, ln, out)

    print("KERNEL_OK")
</pallas_src>

<mosaic_0001>
module attributes {stable_mosaic.version = 11 : i64} {
  func.func @kernel(%arg0: i32, %arg1: i32, %arg2: memref<8x16xf32, #tpu.memory_space<vmem>>, %arg3: memref<8x16xf32, #tpu.memory_space<vmem>>, %arg4: memref<8x16xf32, #tpu.memory_space<vmem>>, %arg5: memref<8x32xf32, #tpu.memory_space<vmem>>, %arg6: memref<8x32xf32, #tpu.memory_space<vmem>>, %arg7: memref<8x1xf32, #tpu.memory_space<vmem>>, %arg8: memref<1x8xf32, #tpu.memory_space<vmem>>, %arg9: memref<1x1x1xf32, #tpu.memory_space<vmem>>, %arg10: memref<1x1x1xf32, #tpu.memory_space<vmem>>, %arg11: memref<8x4xf32, #tpu.memory_space<vmem>>, %arg12: memref<8x16xf32, #tpu.memory_space<vmem>>, %arg13: memref<8x32xf32, #tpu.memory_space<vmem>>, %arg14: memref<1x8x8xf32, #tpu.memory_space<vmem>>) attributes {dimension_semantics = [#tpu.dimension_semantics<parallel>, #tpu.dimension_semantics<arbitrary>], iteration_bounds = array<i64: 1, 1>, scalar_prefetch = 0 : i64, scratch_operands = 4 : i64, tpu.core_type = #tpu.core_type<tc>, window_params = [{transform_indices = @transform_0, window_bounds = array<i64: 8, 16>}, {transform_indices = @transform_1, window_bounds = array<i64: 8, 16>}, {transform_indices = @transform_2, window_bounds = array<i64: 8, 16>}, {transform_indices = @transform_3, window_bounds = array<i64: 8, 32>}, {transform_indices = @transform_4, window_bounds = array<i64: 8, 32>}, {transform_indices = @transform_5, window_bounds = array<i64: 8, 1>}, {transform_indices = @transform_6, window_bounds = array<i64: 1, 8>}, {transform_indices = @transform_7, window_bounds = array<i64: 1, 1, 1>}, {transform_indices = @transform_8, window_bounds = array<i64: 1, 1, 1>}]} {
    %c0_i32 = arith.constant 0 : i32
    %0 = arith.cmpi eq, %arg1, %c0_i32 : i32
    %1 = arith.extui %0 : i1 to i32
    %c0_i32_0 = arith.constant 0 : i32
    %2 = arith.cmpi ne, %1, %c0_i32_0 : i32
    scf.if %2 {
      %77 = tpu.iota {dimensions = array<i32: 1>} : vector<8x4xi32>
      %c2_i32_30 = arith.constant 2 : i32
      %c0_i32_31 = arith.constant 0 : i32
      %78 = arith.cmpi eq, %c2_i32_30, %c0_i32_31 : i32
      %c1_i32_32 = arith.constant 1 : i32
      %79 = arith.select %78, %c1_i32_32, %c2_i32_30 : i32
      %80 = vector.broadcast %79 : i32 to vector<8x4xi32>
      %81 = arith.remsi %77, %80 : vector<8x4xi32>
      %c0_i32_33 = arith.constant 0 : i32
      %82 = vector.broadcast %c0_i32_33 : i32 to vector<8x4xi32>
      %83 = arith.cmpi ne, %81, %82 : vector<8x4xi32>
      %c0_i32_34 = arith.constant 0 : i32
      %84 = vector.broadcast %c0_i32_34 : i32 to vector<8x4xi32>
      %85 = arith.cmpi slt, %81, %84 : vector<8x4xi32>
      %c0_i32_35 = arith.constant 0 : i32
      %86 = arith.cmpi slt, %79, %c0_i32_35 : i32
      %87 = vector.broadcast %86 : i1 to vector<8x4xi1>
      %88 = vector.broadcast %87 : vector<8x4xi1> to vector<8x4xi1>
      %89 = arith.xori %85, %88 : vector<8x4xi1>
      %90 = arith.andi %89, %83 : vector<8x4xi1>
      %91 = vector.broadcast %79 : i32 to vector<8x4xi32>
      %92 = arith.addi %81, %91 : vector<8x4xi32>
      %93 = arith.select %90, %92, %81 : vector<8x4xi1>, vector<8x4xi32>
      %c0_i32_36 = arith.constant 0 : i32
      %94 = vector.broadcast %c0_i32_36 : i32 to vector<8x4xi32>
      %95 = arith.cmpi eq, %93, %94 : vector<8x4xi32>
      %cst_37 = arith.constant -1.000000e+30 : f32
      %cst_38 = arith.constant 0.000000e+00 : f32
      %96 = vector.broadcast %cst_37 : f32 to vector<8x4xf32>
      %97 = vector.broadcast %cst_38 : f32 to vector<8x4xf32>
      %98 = arith.select %95, %96, %97 : vector<8x4xi1>, vector<8x4xf32>
      %c0_39 = arith.constant 0 : index
      %c0_40 = arith.constant 0 : index
      %99 = vector.load %arg11[%c0_39, %c0_40] : memref<8x4xf32, #tpu.memory_space<vmem>>, vector<8x4xf32>
      tpu.vector_store %arg11[%c0_39, %c0_40], %98 {strides = array<i32>} : memref<8x4xf32, #tpu.memory_space<vmem>>, vector<8x4xf32>,
      %c0_41 = arith.constant 0 : index
      %c0_42 = arith.constant 0 : index
      %100 = vector.load %arg2[%c0_41, %c0_42] : memref<8x16xf32, #tpu.memory_space<vmem>>, vector<8x16xf32>
      %cst_43 = arith.constant 1.000000e+01 : f32
      %101 = vector.broadcast %cst_43 : f32 to vector<8x16xf32>
      %102 = arith.mulf %100, %101 : vector<8x16xf32>
      %c0_44 = arith.constant 0 : index
      %c0_45 = arith.constant 0 : index
      %103 = vector.load %arg12[%c0_44, %c0_45] : memref<8x16xf32, #tpu.memory_space<vmem>>, vector<8x16xf32>
      tpu.vector_store %arg12[%c0_44, %c0_45], %102 {strides = array<i32>} : memref<8x16xf32, #tpu.memory_space<vmem>>, vector<8x16xf32>,
      %c0_46 = arith.constant 0 : index
      %c0_47 = arith.constant 0 : index
      %104 = vector.load %arg5[%c0_46, %c0_47] : memref<8x32xf32, #tpu.memory_space<vmem>>, vector<8x32xf32>
      %cst_48 = arith.constant 1.000000e+01 : f32
      %105 = vector.broadcast %cst_48 : f32 to vector<8x32xf32>
      %106 = arith.mulf %104, %105 : vector<8x32xf32>
      %c0_49 = arith.constant 0 : index
      %c0_50 = arith.constant 0 : index
      %107 = vector.load %arg13[%c0_49, %c0_50] : memref<8x32xf32, #tpu.memory_space<vmem>>, vector<8x32xf32>
      tpu.vector_store %arg13[%c0_49, %c0_50], %106 {strides = array<i32>} : memref<8x32xf32, #tpu.memory_space<vmem>>, vector<8x32xf32>,
    } else {
    }
    %c0 = arith.constant 0 : index
    %c0_1 = arith.constant 0 : index
    %3 = vector.load %arg11[%c0, %c0_1] : memref<8x4xf32, #tpu.memory_space<vmem>>, vector<8x4xf32>
    %4 = vector.extract_strided_slice %3 {offsets = [0, 0], sizes = [8, 1], strides = [1, 1]} : vector<8x4xf32> to vector<8x1xf32>
    %5 = vector.extract_strided_slice %3 {offsets = [0, 1], sizes = [8, 1], strides = [1, 1]} : vector<8x4xf32> to vector<8x1xf32>
    %6 = vector.extract_strided_slice %3 {offsets = [0, 2], sizes = [8, 1], strides = [1, 1]} : vector<8x4xf32> to vector<8x1xf32>
    %7 = vector.extract_strided_slice %3 {offsets = [0, 3], sizes = [8, 1], strides = [1, 1]} : vector<8x4xf32> to vector<8x1xf32>
    %c0_2 = arith.constant 0 : index
    %c0_3 = arith.constant 0 : index
    %8 = vector.load %arg12[%c0_2, %c0_3] : memref<8x16xf32, #tpu.memory_space<vmem>>, vector<8x16xf32>
    %c0_4 = arith.constant 0 : index
    %c0_5 = arith.constant 0 : index
    %9 = vector.load %arg4[%c0_4, %c0_5] : memref<8x16xf32, #tpu.memory_space<vmem>>, vector<8x16xf32>
    %cst = arith.constant dense<0.000000e+00> : vector<8x8xf32>
    %10 = tpu.matmul %8, %9, %cst {dimension_numbers = #tpu.dot_dimension_numbers<[1], [1], [0], [0], [0, 0, 1, 0], [], []>} : vector<8x16xf32>, vector<8x16xf32>, vector<8x8xf32> -> vector<8x8xf32>
    %c0_6 = arith.constant 0 : index
    %c0_7 = arith.constant 0 : index
    %11 = vector.load %arg13[%c0_6, %c0_7] : memref<8x32xf32, #tpu.memory_space<vmem>>, vector<8x32xf32>
    %c0_8 = arith.constant 0 : index
    %c0_9 = arith.constant 0 : index
    %12 = vector.load %arg6[%c0_8, %c0_9] : memref<8x32xf32, #tpu.memory_space<vmem>>, vector<8x32xf32>
    %cst_10 = arith.constant dense<0.000000e+00> : vector<8x8xf32>
    %13 = tpu.matmul %11, %12, %cst_10 {dimension_numbers = #tpu.dot_dimension_numbers<[1], [1], [0], [0], [0, 0, 1, 0], [], []>} : vector<8x32xf32>, vector<8x32xf32>, vector<8x8xf32> -> vector<8x8xf32>
    %cst_11 = arith.constant dense<0xFF800000> : vector<8xf32>
    %14 = vector.multi_reduction <maximumf>, %10, %cst_11 [1] : vector<8x8xf32> to vector<8xf32>
    %15 = vector.shape_cast %14 : vector<8xf32> to vector<8x1xf32>
    %16 = arith.maximumf %4, %15 : vector<8x1xf32>
    %17 = arith.subf %4, %16 : vector<8x1xf32>
    %18 = math.exp %17 : vector<8x1xf32>
    %19 = arith.mulf %5, %18 : vector<8x1xf32>
    %20 = vector.broadcast %16 : vector<8x1xf32> to vector<8x8xf32>
    %21 = arith.subf %10, %20 : vector<8x8xf32>
    %22 = math.exp %21 : vector<8x8xf32>
    %cst_12 = arith.constant dense<0.000000e+00> : vector<8xf32>
    %23 = vector.multi_reduction <add>, %22, %cst_12 [1] : vector<8x8xf32> to vector<8xf32>
    %24 = vector.shape_cast %23 : vector<8xf32> to vector<8x1xf32>
    %25 = arith.addf %19, %24 : vector<8x1xf32>
    %cst_13 = arith.constant dense<0xFF800000> : vector<8xf32>
    %26 = vector.multi_reduction <maximumf>, %13, %cst_13 [1] : vector<8x8xf32> to vector<8xf32>
    %27 = vector.shape_cast %26 : vector<8xf32> to vector<8x1xf32>
    %28 = arith.maximumf %6, %27 : vector<8x1xf32>
    %29 = arith.subf %6, %28 : vector<8x1xf32>
    %30 = math.exp %29 : vector<8x1xf32>
    %31 = arith.mulf %7, %30 : vector<8x1xf32>
    %32 = vector.broadcast %28 : vector<8x1xf32> to vector<8x8xf32>
    %33 = arith.subf %13, %32 : vector<8x8xf32>
    %34 = math.exp %33 : vector<8x8xf32>
    %cst_14 = arith.constant dense<0.000000e+00> : vector<8xf32>
    %35 = vector.multi_reduction <add>, %34, %cst_14 [1] : vector<8x8xf32> to vector<8xf32>
    %36 = vector.shape_cast %35 : vector<8xf32> to vector<8x1xf32>
    %37 = arith.addf %31, %36 : vector<8x1xf32>
    %38 = tpu.iota {dimensions = array<i32: 1>} : vector<8x4xi32>
    %c0_i32_15 = arith.constant 0 : i32
    %39 = vector.broadcast %c0_i32_15 : i32 to vector<8x4xi32>
    %40 = arith.cmpi eq, %38, %39 : vector<8x4xi32>
    %c1_i32 = arith.constant 1 : i32
    %41 = vector.broadcast %c1_i32 : i32 to vector<8x4xi32>
    %42 = arith.cmpi eq, %38, %41 : vector<8x4xi32>
    %c2_i32 = arith.constant 2 : i32
    %43 = vector.broadcast %c2_i32 : i32 to vector<8x4xi32>
    %44 = arith.cmpi eq, %38, %43 : vector<8x4xi32>
    %45 = vector.shape_cast %28 : vector<8x1xf32> to vector<8x1xf32>
    %46 = vector.broadcast %45 : vector<8x1xf32> to vector<8x4xf32>
    %47 = vector.shape_cast %37 : vector<8x1xf32> to vector<8x1xf32>
    %48 = vector.broadcast %47 : vector<8x1xf32> to vector<8x4xf32>
    %49 = arith.select %44, %46, %48 : vector<8x4xi1>, vector<8x4xf32>
    %50 = vector.shape_cast %25 : vector<8x1xf32> to vector<8x1xf32>
    %51 = vector.broadcast %50 : vector<8x1xf32> to vector<8x4xf32>
    %52 = arith.select %42, %51, %49 : vector<8x4xi1>, vector<8x4xf32>
    %53 = vector.shape_cast %16 : vector<8x1xf32> to vector<8x1xf32>
    %54 = vector.broadcast %53 : vector<8x1xf32> to vector<8x4xf32>
    %55 = arith.select %40, %54, %52 : vector<8x4xi1>, vector<8x4xf32>
    %c0_16 = arith.constant 0 : index
    %c0_17 = arith.constant 0 : index
    %56 = vector.load %arg11[%c0_16, %c0_17] : memref<8x4xf32, #tpu.memory_space<vmem>>, vector<8x4xf32>
    tpu.vector_store %arg11[%c0_16, %c0_17], %55 {strides = array<i32>} : memref<8x4xf32, #tpu.memory_space<vmem>>, vector<8x4xf32>,
    %c0_18 = arith.constant 0 : index
    %c0_19 = arith.constant 0 : index
    %57 = vector.load %arg7[%c0_18, %c0_19] : memref<8x1xf32, #tpu.memory_space<vmem>>, vector<8x1xf32>
    %cst_20 = arith.constant 1.000000e+00 : f32
    %58 = vector.broadcast %cst_20 : f32 to vector<8x1xf32>
    %59 = arith.addf %57, %58 : vector<8x1xf32>
    %c0_21 = arith.constant 0 : index
    %c0_22 = arith.constant 0 : index
    %60 = vector.load %arg8[%c0_21, %c0_22] : memref<1x8xf32, #tpu.memory_space<vmem>>, vector<1x8xf32>
    %cst_23 = arith.constant 1.000000e+00 : f32
    %61 = vector.broadcast %cst_23 : f32 to vector<1x8xf32>
    %62 = arith.addf %60, %61 : vector<1x8xf32>
    %63 = vector.broadcast %59 : vector<8x1xf32> to vector<8x8xf32>
    %64 = vector.broadcast %62 : vector<1x8xf32> to vector<8x8xf32>
    %65 = arith.mulf %63, %64 : vector<8x8xf32>
    %cst_24 = arith.constant 2.000000e+00 : f32
    %66 = vector.broadcast %cst_24 : f32 to vector<8x8xf32>
    %67 = arith.cmpf oeq, %65, %66 : vector<8x8xf32>
    %cst_25 = arith.constant -1.000000e+30 : f32
    %68 = vector.broadcast %cst_25 : f32 to vector<8x8xf32>
    %69 = arith.select %67, %13, %68 : vector<8x8xi1>, vector<8x8xf32>
    %70 = arith.index_cast %arg1 : i32 to index
    %c0_26 = arith.constant 0 : index
    %c0_27 = arith.constant 0 : index
    %71 = vector.load %arg14[%70, %c0_26, %c0_27] : memref<1x8x8xf32, #tpu.memory_space<vmem>>, vector<1x8x8xf32>
    %72 = vector.shape_cast %71 : vector<1x8x8xf32> to vector<8x8xf32>
    %73 = vector.shape_cast %69 : vector<8x8xf32> to vector<1x8x8xf32>
    tpu.vector_store %arg14[%70, %c0_26, %c0_27], %73 {strides = array<i32>} : memref<1x8x8xf32, #tpu.memory_space<vmem>>, vector<1x8x8xf32>,
    %c0_i32_28 = arith.constant 0 : i32
    %74 = arith.cmpi eq, %arg1, %c0_i32_28 : i32
    %75 = arith.extui %74 : i1 to i32
    %c0_i32_29 = arith.constant 0 : i32
    %76 = arith.cmpi ne, %75, %c0_i32_29 : i32
    scf.if %76 {
      %c0_30 = arith.constant 0 : index
      %c0_31 = arith.constant 0 : index
      %77 = vector.load %arg11[%c0_30, %c0_31] : memref<8x4xf32, #tpu.memory_space<vmem>>, vector<8x4xf32>
      %78 = vector.extract_strided_slice %77 {offsets = [0, 0], sizes = [8, 1], strides = [1, 1]} : vector<8x4xf32> to vector<8x1xf32>
      %79 = vector.extract_strided_slice %77 {offsets = [0, 1], sizes = [8, 1], strides = [1, 1]} : vector<8x4xf32> to vector<8x1xf32>
      %80 = math.log %79 : vector<8x1xf32>
      %81 = arith.addf %78, %80 : vector<8x1xf32>
      %82 = vector.extract_strided_slice %77 {offsets = [0, 2], sizes = [8, 1], strides = [1, 1]} : vector<8x4xf32> to vector<8x1xf32>
      %83 = vector.extract_strided_slice %77 {offsets = [0, 3], sizes = [8, 1], strides = [1, 1]} : vector<8x4xf32> to vector<8x1xf32>
      %84 = math.log %83 : vector<8x1xf32>
      %85 = arith.addf %82, %84 : vector<8x1xf32>
      %c0_32 = arith.constant 0 : index
      %c0_33 = arith.constant 0 : index
      %86 = vector.load %arg2[%c0_32, %c0_33] : memref<8x16xf32, #tpu.memory_space<vmem>>, vector<8x16xf32>
      %c0_34 = arith.constant 0 : index
      %c0_35 = arith.constant 0 : index
      %87 = vector.load %arg3[%c0_34, %c0_35] : memref<8x16xf32, #tpu.memory_space<vmem>>, vector<8x16xf32>
      %88 = arith.mulf %86, %87 : vector<8x16xf32>
      %cst_36 = arith.constant dense<0.000000e+00> : vector<8xf32>
      %89 = vector.multi_reduction <add>, %88, %cst_36 [1] : vector<8x16xf32> to vector<8xf32>
      %90 = vector.shape_cast %89 : vector<8xf32> to vector<8x1xf32>
      %cst_37 = arith.constant 1.000000e+01 : f32
      %91 = vector.broadcast %cst_37 : f32 to vector<8x1xf32>
      %92 = arith.mulf %90, %91 : vector<8x1xf32>
      %93 = arith.subf %81, %92 : vector<8x1xf32>
      %cst_38 = arith.constant 0.000000e+00 : f32
      %94 = vector.broadcast %cst_38 : f32 to vector<8x1xf32>
      %c0_i32_39 = arith.constant 0 : i32
      %95 = arith.index_cast %c0_i32_39 : i32 to index
      %c0_40 = arith.constant 0 : index
      %c0_41 = arith.constant 0 : index
      %96 = vector.load %arg14[%95, %c0_40, %c0_41] : memref<1x8x8xf32, #tpu.memory_space<vmem>>, vector<1x8x8xf32>
      %97 = vector.shape_cast %96 : vector<1x8x8xf32> to vector<8x8xf32>
      %98 = vector.broadcast %85 : vector<8x1xf32> to vector<8x8xf32>
      %99 = arith.subf %97, %98 : vector<8x8xf32>
      %100 = math.exp %99 : vector<8x8xf32>
      %cst_42 = arith.constant 1.000000e+00 : f32
      %101 = vector.broadcast %cst_42 : f32 to vector<8x8xf32>
      %102 = arith.subf %101, %100 : vector<8x8xf32>
      %103 = math.log %102 : vector<8x8xf32>
      %cst_43 = arith.constant dense<0.000000e+00> : vector<8xf32>
      %104 = vector.multi_reduction <add>, %103, %cst_43 [1] : vector<8x8xf32> to vector<8xf32>
      %105 = vector.shape_cast %104 : vector<8xf32> to vector<8x1xf32>
      %106 = arith.addf %94, %105 : vector<8x1xf32>
      %c1_i32_44 = arith.constant 1 : i32
      %107 = vector.shape_cast %93 : vector<8x1xf32> to vector<1x8x1xf32>
      %cst_45 = arith.constant dense<0.000000e+00> : vector<1xf32>
      %108 = vector.multi_reduction <add>, %107, %cst_45 [1, 2] : vector<1x8x1xf32> to vector<1xf32>
      %109 = vector.shape_cast %108 : vector<1xf32> to vector<1x1x1xf32>
      %110 = vector.extract %109[0, 0, 0] : f32 from vector<1x1x1xf32>
      %111 = vector.broadcast %110 : f32 to vector<1x1xf32>
      %112 = vector.shape_cast %111 : vector<1x1xf32> to vector<1x1x1xf32>
      %c0_46 = arith.constant 0 : index
      %c0_47 = arith.constant 0 : index
      %c0_48 = arith.constant 0 : index
      %113 = vector.load %arg9[%c0_46, %c0_47, %c0_48] : memref<1x1x1xf32, #tpu.memory_space<vmem>>, vector<1x1x1xf32>
      tpu.vector_store %arg9[%c0_46, %c0_47, %c0_48], %112 {strides = array<i32>} : memref<1x1x1xf32, #tpu.memory_space<vmem>>, vector<1x1x1xf32>,
      %114 = vector.shape_cast %106 : vector<8x1xf32> to vector<1x8x1xf32>
      %cst_49 = arith.constant dense<0.000000e+00> : vector<1xf32>
      %115 = vector.multi_reduction <add>, %114, %cst_49 [1, 2] : vector<1x8x1xf32> to vector<1xf32>
      %116 = vector.shape_cast %115 : vector<1xf32> to vector<1x1x1xf32>
      %117 = vector.extract %116[0, 0, 0] : f32 from vector<1x1x1xf32>
      %118 = vector.broadcast %117 : f32 to vector<1x1xf32>
      %cst_50 = arith.constant 0.000000e+00 : f32
      %119 = vector.broadcast %cst_50 : f32 to vector<1x1xf32>
      %120 = arith.subf %119, %118 : vector<1x1xf32>
      %121 = vector.shape_cast %120 : vector<1x1xf32> to vector<1x1x1xf32>
      %c0_51 = arith.constant 0 : index
      %c0_52 = arith.constant 0 : index
      %c0_53 = arith.constant 0 : index
      %122 = vector.load %arg10[%c0_51, %c0_52, %c0_53] : memref<1x1x1xf32, #tpu.memory_space<vmem>>, vector<1x1x1xf32>
      tpu.vector_store %arg10[%c0_51, %c0_52, %c0_53], %121 {strides = array<i32>} : memref<1x1x1xf32, #tpu.memory_space<vmem>>, vector<1x1x1xf32>,
    } else {
    }
    return
  }
  func.func @transform_0(%arg0: i32, %arg1: i32) -> (i32, i32) {
    %c0_i32 = arith.constant 0 : i32
    %c0_i32_0 = arith.constant 0 : i32
    return %arg0, %c0_i32 : i32, i32
  }
  func.func @transform_1(%arg0: i32, %arg1: i32) -> (i32, i32) {
    %c0_i32 = arith.constant 0 : i32
    %c0_i32_0 = arith.constant 0 : i32
    return %arg0, %c0_i32 : i32, i32
  }
  func.func @transform_2(%arg0: i32, %arg1: i32) -> (i32, i32) {
    %c0_i32 = arith.constant 0 : i32
    %c0_i32_0 = arith.constant 0 : i32
    return %arg1, %c0_i32 : i32, i32
  }
  func.func @transform_3(%arg0: i32, %arg1: i32) -> (i32, i32) {
    %c0_i32 = arith.constant 0 : i32
    %c0_i32_0 = arith.constant 0 : i32
    return %arg0, %c0_i32 : i32, i32
  }
  func.func @transform_4(%arg0: i32, %arg1: i32) -> (i32, i32) {
    %c0_i32 = arith.constant 0 : i32
    %c0_i32_0 = arith.constant 0 : i32
    return %arg1, %c0_i32 : i32, i32
  }
  func.func @transform_5(%arg0: i32, %arg1: i32) -> (i32, i32) {
    %c0_i32 = arith.constant 0 : i32
    %c0_i32_0 = arith.constant 0 : i32
    return %arg0, %c0_i32 : i32, i32
  }
  func.func @transform_6(%arg0: i32, %arg1: i32) -> (i32, i32) {
    %c0_i32 = arith.constant 0 : i32
    %c0_i32_0 = arith.constant 0 : i32
    return %c0_i32, %arg1 : i32, i32
  }
  func.func @transform_7(%arg0: i32, %arg1: i32) -> (i32, i32, i32) {
    %c0_i32 = arith.constant 0 : i32
    %c0_i32_0 = arith.constant 0 : i32
    %c0_i32_1 = arith.constant 0 : i32
    return %arg0, %c0_i32, %c0_i32_0 : i32, i32, i32
  }
  func.func @transform_8(%arg0: i32, %arg1: i32) -> (i32, i32, i32) {
    %c0_i32 = arith.constant 0 : i32
    %c0_i32_0 = arith.constant 0 : i32
    %c0_i32_1 = arith.constant 0 : i32
    return %arg0, %c0_i32, %c0_i32_0 : i32, i32, i32
  }
}

</mosaic_0001>

<bundles_post_ra>
// kernel: tpu_custom_call.1
= control target key start
LH: loop header
LB: loop body
LE: loop exit
PB: predicated region body
PF: predicated region fallthrough
CT: control target
= control target key end

     0   :  { %14 = vsyncpa [#allocation7], 0  ;;  %s731_s0 = inlined_call_operand.vmem [shape: f32[8,16], index: 0, kind: input, shape index: {}]   ;;  %s732_s1 = inlined_call_operand.hbm [shape: f32[8,16], index: 1, kind: input, shape index: {}]   ;;  %s733_s2 = inlined_call_operand.vmem [shape: f32[8,16], index: 2, kind: input, shape index: {}]   ;;  %s734_s3 = inlined_call_operand.hbm [shape: f32[8,32], index: 3, kind: input, shape index: {}]   ;;  %s735_s4 = inlined_call_operand.vmem [shape: f32[8,32], index: 4, kind: input, shape index: {}]   ;;  %s736_s5 = inlined_call_operand.vmem [shape: f32[8,1], index: 5, kind: input, shape index: {}]   ;;  %s737_s6 = inlined_call_operand.vmem [shape: f32[1,8], index: 6, kind: input, shape index: {}]   ;;  %s738_s7 = inlined_call_operand.hbm [shape: f32[1,1,1], index: 7, kind: output, shape index: {0}]   ;;  %s739_s8 = inlined_call_operand.hbm [shape: f32[1,1,1], index: 8, kind: output, shape index: {1}]  }
   0x1   :  { %15 = vsyncpa [#allocation10], 0 }
   0x2   :  { %16 = vsyncpa [#allocation8], 0 }
   0x3   :  { %17 = vsyncpa [#allocation13], 0  ;;  %s575_s27 = smov [#allocation6]   ;;  %s576_s29 = smov [#allocation9]  }
   0x4   :  { %s26_s28 = sshll.u32 %s575_s27, 4  ;;  %s38_s30 = sshll.u32 %s576_s29, 4  ;;  %s27_s28 = int_to_ptr.vmem [resolvable:$true] %s26_s28  ;;  %s39_s30 = int_to_ptr.vmem [resolvable:$true] %s38_s30 }
   0x5   :  { %s479_s11 = scalar_lea.hbm %s732_s1, 128 }
   0x6   :  { %p480_p0 = scmp.ne.s32.totalorder %s732_s1, %s479_s11  ;;  %p483_p1 = scmp.lt.u32.totalorder %s479_s11, %s732_s1 }
   0x8   :  { %p485_p2 = pnand %p483_p1, %p480_p0 }
   0xa   :  { %488 = shalt.err (!%p485_p2)
}
   0xb   :  { %s489_s16 = scalar_lea.vmem %s27_s28, 128  ;;  %p494_p4 = scmp.lt.s32.totalorder %s27_s28, %s27_s28 }
   0xc   :  { %p490_p3 = scmp.ne.s32.totalorder %s27_s28, %s489_s16  ;;  %p495_p5 = scmp.lt.s32.totalorder %s489_s16, %s489_s16 }
   0xe   :  { %p496_p6 = por %p495_p5, %p494_p4 }
  0x10   :  { %p497_p7 = pnand %p496_p6, %p490_p3 }
  0x12   :  { %500 = shalt.err (!%p497_p7)
}
  0x13   :  { %29 = dma.hbm_to_vmem [thread:$0]  %s732_s1, 128, %s27_s28, [#allocation7]  }
  0x14   :  { %s501_s21 = scalar_lea.hbm %s734_s3, 128 }
  0x15   :  { %p502_p8 = scmp.ne.s32.totalorder %s734_s3, %s501_s21  ;;  %p505_p9 = scmp.lt.u32.totalorder %s501_s21, %s734_s3 }
  0x17   :  { %p507_p10 = pnand %p505_p9, %p502_p8 }
  0x19   :  { %510 = shalt.err (!%p507_p10)
}
  0x1a   :  { %s511_s26 = scalar_lea.vmem %s39_s30, 128  ;;  %p516_p12 = scmp.lt.s32.totalorder %s39_s30, %s39_s30 }
  0x1b   :  { %p512_p11 = scmp.ne.s32.totalorder %s39_s30, %s511_s26  ;;  %p517_p13 = scmp.lt.s32.totalorder %s511_s26, %s511_s26 }
  0x1d   :  { %p518_p0 = por %p517_p13, %p516_p12 }
  0x1f   :  { %p519_p1 = pnand %p518_p0, %p512_p11 }
  0x21   :  { %522 = shalt.err (!%p519_p1)
}
  0x22   :  { %41 = dma.hbm_to_vmem [thread:$0]  %s734_s3, 128, %s39_s30, [#allocation10]  }
  0x23   :  { %567 = dma.done.wait [#allocation7], 128  }
  0x24   :  { %568 = vsyncadd [#allocation7], 4294967168 }
  0x25   :  { %569 = dma.done.wait [#allocation10], 128  }
  0x26   :  { %570 = vsyncadd [#allocation10], 4294967168  ;;  %v58_v0 = vlaneseq  ;;  %v577_v1 = vmov 0.0   ;;  %vm578_vm0 = vmmov 0   ;;  %vm74_vm1 = vcmask 31744   ;;  %v80_v5 = vld [vmem:[#allocation9] sm:$0xff] }
  0x27   :  { %438 = vmatprep.subr.mxu1 %v577_v1  ;;  %433 = vmatprep.subr.mxu0 %v577_v1  ;;  %vm82_vm3 = vcmask 261120   ;;  %v165_v6 = vld [vmem:[%s735_s4] sm:$0xff]  ;;  %vm78_vm4 = vcmask 130048   ;;  %v81_v8 = vmul.f32 10.0, %v80_v5  ;;  %vm243_vm5 = vcmask 64512   ;;  %s584_s11 = smov 127  }
  0x28   :  { %v657_v2 = vand.u32 127, %v58_v0  ;;  %440 = vmatprep.mubr.msk.f32.mxu1 %vm578_vm0, %v577_v1  ;;  %435 = vmatprep.mubr.msk.f32.mxu0 %vm578_vm0, %v577_v1  ;;  %v666_v7 = vld [vmem:[%s731_s0] sm:$0xff]  ;;  %v579_v19 = vmov 2   ;;  %v580_v25 = vmov 0   ;;  %v581_v41 = vmov 3   ;;  %s582_s0 = smov 1  }
  0x29   :  { %439 = vmatpush3.xpose.msk.msra.mxu1 %vm82_vm3, %v165_v6  ;;  %v77_v9 = vmul.f32 10.0, %v666_v7  ;;  %v86_v10 = vld [vmem:[%s733_s2] sm:$0xff]  ;;  %83 = vst.msk [vmem:[#allocation4] sm:$0xff] %vm82_vm3, %v81_v8  ;;  %459 = vset.pattern.permute.xlu1 %v579_v19  ;;  %v583_v43 = vmov 1   ;;  %vm368_vm10 = vcmask 7168   ;;  %vm380_vm11 = vcmask 0  }
  0x2a   :  { %v64_v3 = vand.u32 1, %v657_v2  ;;  %434 = vmatpush3.xpose.msk.msra.mxu0 %vm78_vm4, %v86_v10  ;;  %461 = vset.pattern.permute.xlu0 %v581_v41  ;;  %v345_v52 = vld [vmem:[#allocation6] sm:$0xff]  ;;  %vm296_vm6 = vcmp.eq.s32.totalorder %v657_v2, 2  ;;  %vm295_vm7 = vcmp.eq.s32.totalorder %v657_v2, 1  ;;  %vm294_vm8 = vcmp.eq.s32.totalorder %v657_v2, 0 }
  0x2b   :  { %79 = vst.msk [vmem:[#allocation3] sm:$0xff] %vm78_vm4, %v77_v9  ;;  %v346_v53 = vmul.f32 %v345_v52, %v666_v7  ;;  %v312_v62 = vld [vmem:[%s736_s5] sm:$0xff] }
  0x2c   :  { %vm72_vm2 = vcmp.eq.s32.totalorder %v64_v3, 0  ;;  %v314_v5 = vld [vmem:[%s737_s6] sm:$0x1]  ;;  %s585_s6 = smov [#allocation11]  }
  0x2d   :  { %v73_v4 = vsel %vm72_vm2, -1e+30, %v577_v1  ;;  %v347_v54 = vsel %vm78_vm4, %v346_v53, 0.0  ;;  %v313_v1 = vadd.f32 1.0, %v312_v62  ;;  %v315_v6 = vadd.f32 1.0, %v314_v5  ;;  %s401_s14 = sshll.u32 %s585_s6, 4  ;;  %s402_s14 = int_to_ptr.vmem [resolvable:$true] %s401_s14 }
  0x2e   :  { %75 = vst.msk [vmem:[#allocation2] sm:$0xff] %vm74_vm1, %v73_v4  ;;  %v323_v4 = vshrl.u32 %v58_v0, 7  ;;  %s523_s15 = scalar_lea.vmem %s402_s14, 16  ;;  %s527_s16 = scalar_lea.vmem %s402_s14, 32 }
  0x2f   :  { %p524_p2 = scmp.ne.s32.totalorder %s402_s14, %s523_s15  ;;  %p528_p3 = scmp.lt.s32.totalorder %s402_s14, %s402_s14 }
  0x30   :  { %v164_v11 = vld [vmem:[#allocation4] sm:$0xff]  ;;  %v324_v7 = vsub.s32 0, %v323_v4  ;;  %p529_p4 = scmp.lt.s32.totalorder %s527_s16, %s523_s15 }
  0x31   :  { %441 = vmatmul.mubr.msk.f32.vlgmr.msra.gmra.mrb[0].mxu1 %vm82_vm3, %v164_v11 }
  0x32   :  { %v85_v12 = vld [vmem:[#allocation3] sm:$0xff]  ;;  %v325_v8 = vrot.slane %v315_v6, %v324_v7  ;;  %p530_p5 = por %p529_p4, %p528_p3 }
  0x33   :  { %436 = vmatmul.mubr.msk.f32.vlgmr.msra.gmra.mrb[0].mxu0 %vm78_vm4, %v85_v12 }
  0x34   :  { %p531_p6 = pnand %p530_p5, %p524_p2 }
  0x35   :  { %v84_v20 = vld [vmem:[#allocation2] sm:$0xff] }
 0x104   :  { %v679_v13 = vpop.f32.mrb[0].mxu1 }
 0x105   :  { %v442_v15 = vpop.f32.mrb[1].mxu1  ;;  %v268_v16 = vsel %vm243_vm5, %v679_v13, -inf }
 0x106   :  { %v160_v14 = vpop.f32.mrb[0].mxu0  ;;  %269 = vmax.xlane.f32.xlu0 %v268_v16 }
 0x107   :  { %v437_v17 = vpop.f32.mrb[1].mxu0  ;;  %v244_v18 = vsel %vm243_vm5, %v160_v14, -inf }
 0x10a   :  { %245 = vmax.xlane.f32.xlu0 %v244_v18 }
 0x193   :  { %v270_v21 = vpop.xlane.xlu0 %269 }
 0x194   :  { %v271_v22 = vmax.f32 %v84_v20, %v270_v21 }
 0x196   :  { %282 = vperm.xlu1 %459, %v271_v22   ;;  %v272_v35 = vsub.f32 %v84_v20, %v271_v22 }
 0x197   :  { %v246_v23 = vpop.xlane.xlu0 %245 }
 0x198   :  { %v247_v24 = vmax.f32 %v84_v20, %v246_v23  ;;  %v273_v37 = vmul.f32 1.442695, %v272_v35 }
 0x19a   :  { %460 = vset.pattern.permute.xlu1 %v580_v25  ;;  %v248_v38 = vsub.f32 %v84_v20, %v247_v24 }
 0x19b   :  { %258 = vperm.xlu1 %460, %v247_v24  }
 0x19c   :  { %v249_v39 = vmul.f32 1.442695, %v248_v38 }
 0x19f   :  { %462 = vset.pattern.permute.xlu1 %v583_v43 }
 0x215   :  { %v283_v26 = vpop.permute.xlu1 %282 }
 0x216   :  { %v285_v27 = vsub.f32 %v679_v13, %v283_v26 }
 0x218   :  { %v286_v28 = vmul.f32 1.442695, %v285_v27 }
 0x21a   :  { %465 = vpow2.f32 %v286_v28  ;;  %v259_v29 = vpop.permute.xlu1 %258 }
 0x21b   :  { %v261_v30 = vsub.f32 %v160_v14, %v259_v29 }
 0x21d   :  { %v262_v31 = vmul.f32 1.442695, %v261_v30 }
 0x21f   :  { %467 = vpow2.f32 %v262_v31 }
 0x220   :  { %469 = vpow2.f32 %v273_v37 }
 0x221   :  { %471 = vpow2.f32 %v249_v39 }
 0x224   :  { %v466_v32 = vpop.eup %465 }
 0x225   :  { %v288_v33 = vsel %vm243_vm5, %v466_v32, 0.0 }
 0x226   :  { %289 = vadd.xlane.f32.xlu0 %v288_v33 }
 0x229   :  { %v468_v34 = vpop.eup %467 }
 0x22a   :  { %v264_v36 = vsel %vm243_vm5, %v468_v34, 0.0  ;;  %v470_v40 = vpop.eup %469 }
 0x22b   :  { %265 = vadd.xlane.f32.xlu1 %v264_v36  ;;  %v472_v42 = vpop.eup %471 }
 0x23c   :  { %276 = vrot.lane.b32.xlu0 %v470_v40, %s582_s0 }
 0x240   :  { %252 = vrot.lane.b32.xlu0 %v472_v42, %s582_s0 }
 0x2b3   :  { %v290_v44 = vpop.xlane.xlu0 %289 }
 0x2b7   :  { %v277_v45 = vpop.permute.xlu0 %276 }
 0x2b8   :  { %v279_v46 = vmul.f32 %v277_v45, %v84_v20  ;;  %v266_v50 = vpop.xlane.xlu1 %265 }
 0x2ba   :  { %v291_v47 = vadd.f32 %v290_v44, %v279_v46 }
 0x2bb   :  { %v253_v48 = vpop.permute.xlu0 %252 }
 0x2bc   :  { %v255_v49 = vmul.f32 %v253_v48, %v84_v20  ;;  %299 = vperm.xlu0 %461, %v291_v47  }
 0x2be   :  { %v267_v51 = vadd.f32 %v266_v50, %v255_v49 }
 0x2c0   :  { %305 = vperm.xlu1 %462, %v267_v51   ;;  %463 = vset.pattern.permute.xlu0 %v580_v25 }
 0x2e4   :  { %348 = vadd.xlane.f32.xlu1 %v347_v54 }
 0x33b   :  { %v300_v55 = vpop.permute.xlu0 %299 }
 0x33c   :  { %v302_v56 = vsel %vm296_vm6, %v283_v26, %v300_v55 }
 0x33f   :  { %v306_v57 = vpop.permute.xlu1 %305 }
 0x340   :  { %v308_v58 = vsel %vm295_vm7, %v306_v57, %v302_v56 }
 0x341   :  { %v309_v59 = vsel %vm294_vm8, %v259_v29, %v308_v58 }
 0x342   :  { %311 = vst.msk [vmem:[#allocation2] sm:$0xff] %vm74_vm1, %v309_v59 }
 0x349   :  { %v336_v60 = vld [vmem:[#allocation2] sm:$0xff] }
 0x34a   :  { %473 = vlog2.f32 %v336_v60 }
 0x354   :  { %v474_v61 = vpop.eup %473 }
 0x355   :  { %v338_v63 = vmul.f32 0.6931472, %v474_v61 }
 0x357   :  { %340 = vrot.lane.b32.xlu0 %v338_v63, %s584_s11 }
 0x35b   :  { %318 = vperm.xlu0 %463, %v313_v1  }
 0x35f   :  { %464 = vset.pattern.permute.xlu0 %v579_v19 }
 0x371   :  { %v349_v18 = vpop.xlane.xlu1 %348 }
 0x372   :  { %v350_v19 = vmul.f32 10.0, %v349_v18 }
 0x3c9   :  { %v341_v2 = vpop.permute.xlu0 %340 }
 0x3ca   :  { %v343_v3 = vadd.f32 %v341_v2, %v336_v60 }
 0x3cc   :  { %355 = vperm.xlu0 %464, %v343_v3   ;;  %v351_v23 = vsub.f32 %v343_v3, %v350_v19 }
 0x3da   :  { %v319_v9 = vpop.permute.xlu0 %318 }
 0x3db   :  { %v327_v10 = vmul.f32 %v325_v8, %v319_v9 }
 0x3dd   :  { %vm328_vm9 = vcmp.eq.f32.partialorder %v327_v10, 2.0 }
 0x3de   :  { %v329_v11 = vsel %vm328_vm9, %v679_v13, -1e+30  ;;  %v369_v13 = vsel %vm368_vm10, %v351_v23, 0.0 }
 0x3df   :  { %332 = vst.msk [vmem:[#allocation5] sm:$0xff] %vm243_vm5, %v329_v11 }
 0x3e6   :  { %v352_v12 = vld [vmem:[#allocation5] sm:$0xff] }
 0x44b   :  { %v356_v14 = vpop.permute.xlu0 %355 }
 0x44c   :  { %v358_v15 = vsub.f32 %v352_v12, %v356_v14 }
 0x44e   :  { %v359_v16 = vmul.f32 1.442695, %v358_v15 }
 0x450   :  { %475 = vpow2.f32 %v359_v16 }
 0x45a   :  { %v476_v0 = vpop.eup %475 }
 0x45b   :  { %v361_v17 = vsub.f32 1.0, %v476_v0 }
 0x45d   :  { %477 = vlog2.f32 %v361_v17 }
 0x467   :  { %v478_v20 = vpop.eup %477 }
 0x468   :  { %v363_v21 = vmul.f32 0.6931472, %v478_v20 }
 0x46a   :  { %v364_v22 = vsel %vm243_vm5, %v363_v21, 0.0 }
 0x46b   :  { %365 = vadd.xlane.f32.xlu0 %v364_v22 }
 0x46f   :  { %370 = vadd.xlane.f32.xlu0 %v369_v13 }
 0x4f8   :  { %v366_v24 = vpop.xlane.xlu0 %365 }
 0x4f9   :  { %v382_v25 = vsel %vm368_vm10, %v366_v24, 0.0 }
 0x4fa   :  { %383 = vadd.xlane.f32.xlu1 %v382_v25 }
 0x4fc   :  { %v371_v26 = vpop.xlane.xlu0 %370 }
 0x4fd   :  { %v372_v27 = vrot.slane %v371_v26, 4 }
 0x4ff   :  { %v373_v28 = vadd.f32 %v372_v27, %v371_v26 }
 0x501   :  { %v374_v29 = vrot.slane %v373_v28, 2 }
 0x503   :  { %v375_v30 = vadd.f32 %v374_v29, %v373_v28 }
 0x505   :  { %v376_v31 = vrot.slane %v375_v30, 1 }
 0x507   :  { %v377_v32 = vadd.f32 %v376_v31, %v375_v30 }
 0x509   :  { %443 = vpush %v377_v32 }
 0x53a   :  { %s444_s5 = spop %443 }
 0x53b   :  { %v379_v33 = vstv %s444_s5 }
 0x53c   :  { %381 = vst.msk [vmem:[#allocation11] sm:$0x1] %vm380_vm11, %v379_v33 }
 0x53d   :  { %534 = shalt.err (!%p531_p6)
}
 0x53e   :  { %s535_s19 = scalar_lea.hbm %s738_s7, 16 }
 0x53f   :  { %p536_p7 = scmp.ne.s32.totalorder %s738_s7, %s535_s19  ;;  %p539_p8 = scmp.lt.u32.totalorder %s535_s19, %s738_s7 }
 0x541   :  { %p541_p9 = pnand %p539_p8, %p536_p7 }
 0x543   :  { %544 = shalt.err (!%p541_p9)
}
 0x544   :  { %404 = dma.vmem_to_hbm [thread:$0]  %s402_s14, 16, %s738_s7, [#allocation8]  }
 0x545   :  { %s586_s26 = smov [#allocation12]  }
 0x546   :  { %s411_s1 = sshll.u32 %s586_s26, 4  ;;  %s412_s1 = int_to_ptr.vmem [resolvable:$true] %s411_s1 }
 0x547   :  { %s545_s3 = scalar_lea.vmem %s412_s1, 16  ;;  %s549_s28 = scalar_lea.vmem %s412_s1, 32 }
 0x548   :  { %p546_p10 = scmp.ne.s32.totalorder %s412_s1, %s545_s3  ;;  %p550_p11 = scmp.lt.s32.totalorder %s412_s1, %s412_s1 }
 0x549   :  { %p551_p12 = scmp.lt.s32.totalorder %s549_s28, %s545_s3 }
 0x54b   :  { %p552_p13 = por %p551_p12, %p550_p11 }
 0x54d   :  { %p553_p0 = pnand %p552_p13, %p546_p10 }
 0x587   :  { %v384_v34 = vpop.xlane.xlu1 %383 }
 0x588   :  { %v385_v35 = vrot.slane %v384_v34, 4 }
 0x58a   :  { %v386_v36 = vadd.f32 %v385_v35, %v384_v34 }
 0x58c   :  { %v387_v37 = vrot.slane %v386_v36, 2 }
 0x58e   :  { %v388_v38 = vadd.f32 %v387_v37, %v386_v36 }
 0x590   :  { %v389_v39 = vrot.slane %v388_v38, 1 }
 0x592   :  { %v390_v40 = vadd.f32 %v389_v39, %v388_v38 }
 0x594   :  { %445 = vpush %v390_v40 }
 0x5c5   :  { %s446_s27 = spop %445 }
 0x5c6   :  { %v392_v41 = vstv %s446_s27 }
 0x5c7   :  { %v393_v42 = vsub.f32 0.0, %v392_v41 }
 0x5c9   :  { %394 = vst.msk [vmem:[#allocation12] sm:$0x1] %vm380_vm11, %v393_v42 }
 0x5ca   :  { %556 = shalt.err (!%p553_p0)
}
 0x5cb   :  { %s557_s30 = scalar_lea.hbm %s739_s8, 16 }
 0x5cc   :  { %p558_p1 = scmp.ne.s32.totalorder %s739_s8, %s557_s30  ;;  %p561_p2 = scmp.lt.u32.totalorder %s557_s30, %s739_s8 }
 0x5ce   :  { %p563_p3 = pnand %p561_p2, %p558_p1 }
 0x5d0   :  { %566 = shalt.err (!%p563_p3)
}
 0x5d1   :  { %414 = dma.vmem_to_hbm [thread:$0]  %s412_s1, 16, %s739_s8, [#allocation13]  }
 0x5d2   :  { %571 = dma.done.wait [#allocation8], 16  }
 0x5d3   :  { %572 = vsyncadd [#allocation8], 4294967280 }
 0x5d4   :  { %573 = dma.done.wait [#allocation13], 16  }
 0x5d5   :  { %574 = vsyncadd [#allocation13], 4294967280 }
 0x5d6   :  { %421 = vsyncpa [#allocation7], 1 }
 0x5d7   :  { %422 = vsyncpa [#allocation10], 1 }
 0x5d8   :  { %423 = vsyncpa [#allocation8], 1 }
 0x5d9   :  { %424 = vsyncpa [#allocation13], 1 }

</bundles_post_ra>
